<compile_context>
chip_gen: v6e
topology: v6e:2x2x1
jax: 0.10.0
libtpu: 0.0.40
codegen_flags: <defaults>
</compile_context>

<pallas_src>
import functools

import jax
import jax.numpy as jnp
from jax.experimental import pallas as pl
from jax.experimental.pallas import tpu as pltpu

_LANE = 128
_SUBLANE = 8
_MAX_BLOCK_ROWS = 2048   # (2048,128) f32 = 1 MiB / block: >=86% of HBM roofline
_NCORES = 2              # leading "parallel" grid axis (v7x megacore); no-op on v5e/v6e


def _round_up(x: int, m: int) -> int:
    return ((x + m - 1) // m) * m


# ---------------------------------------------------------------------------
# Pallas kernels
#
# The output block (8,128) is resident across the reduction axis and is used
# directly as the accumulator.  Per step we only do: load, (upcast,) sub, mul,
# vreg-wise adds — no XLU reduction, no masked 1-lane stores on the hot path.
# ---------------------------------------------------------------------------
def _sumsq_diff_kernel(a_ref, b_ref, acc_ref):
    @pl.when(pl.program_id(1) == 0)
    def _():
        acc_ref[...] = jnp.zeros_like(acc_ref)

    d = a_ref[...].astype(jnp.float32) - b_ref[...].astype(jnp.float32)
    sq = d * d
    # (block_rows,128) -> (block_rows//8, 8, 128); reducing the leading axis is
    # pure vreg+vreg VPU adds (tile-aligned reshape, no cross-lane traffic).
    acc_ref[...] += jnp.sum(sq.reshape(-1, _SUBLANE, _LANE), axis=0)


def _sumsq_kernel(a_ref, acc_ref):
    @pl.when(pl.program_id(1) == 0)
    def _():
        acc_ref[...] = jnp.zeros_like(acc_ref)

    a = a_ref[...].astype(jnp.float32)
    sq = a * a
    acc_ref[...] += jnp.sum(sq.reshape(-1, _SUBLANE, _LANE), axis=0)


# ---------------------------------------------------------------------------
# pallas_call builders (cached per geometry)
# ---------------------------------------------------------------------------
@functools.cache
def _build_sumsq_diff(rows: int, block_rows: int, dtype_name: str):
    steps = rows // (_NCORES * block_rows)
    in_spec = pl.BlockSpec((block_rows, _LANE), lambda c, i: (c * steps + i, 0))
    return pl.pallas_call(
        _sumsq_diff_kernel,
        out_shape=jax.ShapeDtypeStruct((_NCORES * _SUBLANE, _LANE), jnp.float32),
        grid_spec=pltpu.PrefetchScalarGridSpec(
            num_scalar_prefetch=0,
            grid=(_NCORES, steps),
            in_specs=[in_spec, in_spec],
            out_specs=pl.BlockSpec((_SUBLANE, _LANE), lambda c, i: (c, 0)),
        ),
        compiler_params=pltpu.CompilerParams(
            dimension_semantics=("parallel", "arbitrary")),
    )


@functools.cache
def _build_sumsq(rows: int, block_rows: int, dtype_name: str):
    steps = rows // (_NCORES * block_rows)
    in_spec = pl.BlockSpec((block_rows, _LANE), lambda c, i: (c * steps + i, 0))
    return pl.pallas_call(
        _sumsq_kernel,
        out_shape=jax.ShapeDtypeStruct((_NCORES * _SUBLANE, _LANE), jnp.float32),
        grid_spec=pltpu.PrefetchScalarGridSpec(
            num_scalar_prefetch=0,
            grid=(_NCORES, steps),
            in_specs=[in_spec],
            out_specs=pl.BlockSpec((_SUBLANE, _LANE), lambda c, i: (c, 0)),
        ),
        compiler_params=pltpu.CompilerParams(
            dimension_semantics=("parallel", "arbitrary")),
    )


# ---------------------------------------------------------------------------
# Packing: concat flattened params in their native dtype, zero-pad so the row
# count is a multiple of (num_cores * block_rows), reshape to (rows, 128).
# Zero padding contributes 0 to both reductions.
# ---------------------------------------------------------------------------
def _pick_dtype(arrays):
    dt = jnp.result_type(*[a.dtype for a in arrays])
    if dt in (jnp.dtype(jnp.float32), jnp.dtype(jnp.bfloat16), jnp.dtype(jnp.float16)):
        return jnp.dtype(dt)
    return jnp.dtype(jnp.float32)


@functools.cache
def _geometry(total_elems: int, itemsize: int):
    sub = _SUBLANE * (4 // itemsize)          # 8 rows/vreg for f32, 16 for bf16/f16
    rows = max(_round_up(pl.cdiv(total_elems, _LANE), sub), sub)
    block_rows = min(_MAX_BLOCK_ROWS, rows)   # 2048 is a multiple of both 8 and 16
    rows = _round_up(rows, _NCORES * block_rows)
    return rows, block_rows


def _pack(arrays, dtype, rows):
    flat = jnp.concatenate([jnp.ravel(a).astype(dtype) for a in arrays])
    pad = rows * _LANE - flat.shape[0]
    if pad:
        flat = jnp.pad(flat, (0, pad))
    return flat.reshape(rows, _LANE)


# ---------------------------------------------------------------------------
# Parameter selection (mirrors should_decay_parameter / L2_SP.get_keys)
# ---------------------------------------------------------------------------
def _should_decay_parameter(name: str, param: jax.Array) -> bool:
    # TODO(synk): PyTorch also skips params with requires_grad=False; JAX params
    # carry no such flag, so all passed-in params are assumed trainable.
    lname = name.lower()
    if "batchnorm" in lname or "bn" in lname or "bias" in lname:
        return False
    if param.ndim == 1:
        return False
    return True


def _get_keys(model_params: dict, pretrained_state: dict):
    to_decay = [k for k, p in model_params.items() if _should_decay_parameter(k, p)]
    is_in_pretrained, not_in_pretrained = [], []
    for key in to_decay:
        match = key in pretrained_state and model_params[key].shape == pretrained_state[key].shape
        (is_in_pretrained if match else not_in_pretrained).append(key)
    return is_in_pretrained, not_in_pretrained


# ---------------------------------------------------------------------------
# L2-SP module
# ---------------------------------------------------------------------------
class L2SP:
    """L2-SP regularizer. Key selection and the (static) pretrained slab are
    computed once at construction; each call packs only the live model params
    and runs the Pallas sum-of-squares reductions."""

    def __init__(self, model_params: dict, pretrained_state: dict, alpha: float, beta: float):
        self.alpha = float(alpha)
        self.beta = float(beta)
        self.pretrained_keys, self.new_keys = _get_keys(model_params, pretrained_state)

        self._pre_geom = None
        self._pre_slab = None
        if self.pretrained_keys:
            probe = ([model_params[k] for k in self.pretrained_keys]
                     + [pretrained_state[k] for k in self.pretrained_keys])
            dt = _pick_dtype(probe)
            total = sum(int(model_params[k].size) for k in self.pretrained_keys)
            rows, block_rows = _geometry(total, dt.itemsize)
            self._pre_geom = (dt, rows, block_rows)
            # Pretrained weights never change -> pack exactly once.
            self._pre_slab = _pack([pretrained_state[k] for k in self.pretrained_keys], dt, rows)

        self._new_geom = None
        if self.new_keys:
            dt = _pick_dtype([model_params[k] for k in self.new_keys])
            total = sum(int(model_params[k].size) for k in self.new_keys)
            rows, block_rows = _geometry(total, dt.itemsize)
            self._new_geom = (dt, rows, block_rows)

    def __call__(self, model_params: dict):
        towards_pretrained = jnp.float32(0.0)
        towards_0 = jnp.float32(0.0)

        if self.pretrained_keys:
            dt, rows, block_rows = self._pre_geom
            # TODO(synk): this per-call concat/pad of the live model params is one
            # extra HBM pass; a per-parameter scalar-prefetch-offset kernel could
            # stream params in place and remove it.
            a2d = _pack([model_params[k] for k in self.pretrained_keys], dt, rows)
            partial = _build_sumsq_diff(rows, block_rows, dt.name)(a2d, self._pre_slab)
            towards_pretrained = 0.5 * jnp.sum(partial)

        if self.new_keys:
            dt, rows, block_rows = self._new_geom
            c2d = _pack([model_params[k] for k in self.new_keys], dt, rows)
            partial = _build_sumsq(rows, block_rows, dt.name)(c2d)
            towards_0 = 0.5 * jnp.sum(partial)

        # TODO(synk): PyTorch raises ValueError on NaN loss; on-device NaN -> error
        # has no clean Pallas equivalent, so callers should check host-side.
        return jnp.float32(self.alpha) * towards_pretrained + jnp.float32(self.beta) * towards_0


# ---------------------------------------------------------------------------
# Demo / self-check
# ---------------------------------------------------------------------------
if __name__ == "__main__":
    key = jax.random.PRNGKey(0)
    ks = jax.random.split(key, 8)

    # Synthetic "model" parameters: OIHW conv filters, [out,in] fc head (bf16 to
    # exercise native-dtype streaming + in-kernel upcast), plus non-decayed
    # bias / batchnorm params to exercise the filtering logic.
    model_params = {
        "conv1.weight": jax.random.normal(ks[0], (8, 4, 3, 3), jnp.float32),
        "conv1.bias": jax.random.normal(ks[1], (8,), jnp.float32),
        "bn1.weight": jax.random.normal(ks[2], (8,), jnp.float32),
        "conv2.weight": jax.random.normal(ks[3], (8, 8, 3, 3), jnp.float32),
        "fc.weight": jax.random.normal(ks[4], (10, 8), jnp.bfloat16),   # new head
        "fc.bias": jax.random.normal(ks[5], (10,), jnp.bfloat16),
    }
    # Synthetic "pretrained" state: same conv shapes, different values; no fc.
    pretrained_state = {
        "conv1.weight": jax.random.normal(ks[6], (8, 4, 3, 3), jnp.float32),
        "conv2.weight": jax.random.normal(ks[7], (8, 8, 3, 3), jnp.float32),
    }

    alpha, beta = 1e-2, 1e-3

    l2sp = L2SP(model_params, pretrained_state, alpha, beta)
    loss = jax.block_until_ready(l2sp(model_params))

    # Pure-JAX reference for correctness (f32 accumulation, like the kernel).
    tp_ref = 0.5 * (
        jnp.sum((model_params["conv1.weight"] - pretrained_state["conv1.weight"]) ** 2)
        + jnp.sum((model_params["conv2.weight"] - pretrained_state["conv2.weight"]) ** 2)
    )
    t0_ref = 0.5 * jnp.sum(model_params["fc.weight"].astype(jnp.float32) ** 2)
    ref = alpha * tp_ref + beta * t0_ref

    lf = float(loss)
    if lf != lf:
        raise ValueError("invalid loss in L2-SP (NaN)")
    assert abs(lf - float(ref)) <= 1e-5 * max(1.0, abs(float(ref))), (lf, float(ref))

    print("KERNEL_OK")
</pallas_src>

<mosaic_0001>
module attributes {stable_mosaic.version = 11 : i64} {
  func.func @_sumsq_diff_kernel(%arg0: i32, %arg1: i32, %arg2: memref<8x128xf32, #tpu.memory_space<vmem>>, %arg3: memref<8x128xf32, #tpu.memory_space<vmem>>, %arg4: memref<8x128xf32, #tpu.memory_space<vmem>>) attributes {dimension_semantics = [#tpu.dimension_semantics<parallel>, #tpu.dimension_semantics<arbitrary>], iteration_bounds = array<i64: 2, 1>, scalar_prefetch = 0 : i64, scratch_operands = 0 : i64, tpu.core_type = #tpu.core_type<tc>, window_params = [{transform_indices = @transform_0, window_bounds = array<i64: 8, 128>}, {transform_indices = @transform_1, window_bounds = array<i64: 8, 128>}, {transform_indices = @transform_2, window_bounds = array<i64: 8, 128>}]} {
    %c0_i32 = arith.constant 0 : i32
    %0 = arith.cmpi eq, %arg1, %c0_i32 : i32
    %1 = arith.extui %0 : i1 to i32
    %c0_i32_0 = arith.constant 0 : i32
    %2 = arith.cmpi ne, %1, %c0_i32_0 : i32
    scf.if %2 {
      %cst_8 = arith.constant 0.000000e+00 : f32
      %12 = vector.broadcast %cst_8 : f32 to vector<8x128xf32>
      %c0_9 = arith.constant 0 : index
      %c0_10 = arith.constant 0 : index
      %13 = vector.load %arg4[%c0_9, %c0_10] : memref<8x128xf32, #tpu.memory_space<vmem>>, vector<8x128xf32>
      tpu.vector_store %arg4[%c0_9, %c0_10], %12 {strides = array<i32>} : memref<8x128xf32, #tpu.memory_space<vmem>>, vector<8x128xf32>,
    } else {
    }
    %c0 = arith.constant 0 : index
    %c0_1 = arith.constant 0 : index
    %3 = vector.load %arg2[%c0, %c0_1] : memref<8x128xf32, #tpu.memory_space<vmem>>, vector<8x128xf32>
    %c0_2 = arith.constant 0 : index
    %c0_3 = arith.constant 0 : index
    %4 = vector.load %arg3[%c0_2, %c0_3] : memref<8x128xf32, #tpu.memory_space<vmem>>, vector<8x128xf32>
    %5 = arith.subf %3, %4 : vector<8x128xf32>
    %6 = arith.mulf %5, %5 : vector<8x128xf32>
    %c0_4 = arith.constant 0 : index
    %c0_5 = arith.constant 0 : index
    %7 = vector.load %arg4[%c0_4, %c0_5] : memref<8x128xf32, #tpu.memory_space<vmem>>, vector<8x128xf32>
    %8 = vector.shape_cast %6 : vector<8x128xf32> to vector<1x8x128xf32>
    %cst = arith.constant dense<0.000000e+00> : vector<8x128xf32>
    %9 = vector.multi_reduction <add>, %8, %cst [0] : vector<1x8x128xf32> to vector<8x128xf32>
    %10 = arith.addf %7, %9 : vector<8x128xf32>
    %c0_6 = arith.constant 0 : index
    %c0_7 = arith.constant 0 : index
    %11 = vector.load %arg4[%c0_6, %c0_7] : memref<8x128xf32, #tpu.memory_space<vmem>>, vector<8x128xf32>
    tpu.vector_store %arg4[%c0_6, %c0_7], %10 {strides = array<i32>} : memref<8x128xf32, #tpu.memory_space<vmem>>, vector<8x128xf32>,
    return
  }
  func.func @transform_0(%arg0: i32, %arg1: i32) -> (i32, i32) {
    %c1_i32 = arith.constant 1 : i32
    %0 = arith.muli %arg0, %c1_i32 : i32
    %1 = arith.addi %0, %arg1 : i32
    %c0_i32 = arith.constant 0 : i32
    %c0_i32_0 = arith.constant 0 : i32
    return %1, %c0_i32 : i32, i32
  }
  func.func @transform_1(%arg0: i32, %arg1: i32) -> (i32, i32) {
    %c1_i32 = arith.constant 1 : i32
    %0 = arith.muli %arg0, %c1_i32 : i32
    %1 = arith.addi %0, %arg1 : i32
    %c0_i32 = arith.constant 0 : i32
    %c0_i32_0 = arith.constant 0 : i32
    return %1, %c0_i32 : i32, i32
  }
  func.func @transform_2(%arg0: i32, %arg1: i32) -> (i32, i32) {
    %c0_i32 = arith.constant 0 : i32
    %c0_i32_0 = arith.constant 0 : i32
    return %arg0, %c0_i32 : i32, i32
  }
}

</mosaic_0001>

<bundles_post_ra>
// kernel: tpu_custom_call.1
= control target key start
LH: loop header
LB: loop body
LE: loop exit
PB: predicated region body
PF: predicated region fallthrough
CT: control target
= control target key end

     0   :  { %7 = vsyncpa [#allocation3], 0  ;;  %s751_s0 = inlined_call_operand.hbm [shape: f32[16,128], index: 0, kind: input, shape index: {}]   ;;  %s752_s1 = inlined_call_operand.hbm [shape: f32[16,128], index: 1, kind: input, shape index: {}]   ;;  %s753_s2 = inlined_call_operand.hbm [shape: f32[16,128], index: 2, kind: output, shape index: {}]  }
   0x1   :  { %9 = vsyncpa [#allocation3 + $0x1], 0 }
   0x2   :  { %10 = vsyncpa [#allocation6], 0 }
   0x3   :  { %12 = vsyncpa [#allocation6 + $0x1], 0 }
   0x4   :  { %13 = vsyncpa [#allocation4], 0 }
   0x5   :  { %15 = vsyncpa [#allocation4 + $0x1], 0  ;;  %s590_s9 = smov 0   ;;  %s592_s10 = smov 0  }
   0x6   :  { %s594_s11 = smov 0   ;;  %s596_s12 = smov 0  }
   0x7   :  { %s598_s13 = smov 0   ;;  %s600_s14 = smov 0  }
   0x8 LB: > { %s346_s15 = sadd.s32 4294967295, %s570_s14   ;;  %s347_s16 = sadd.s32 4294967294, %s570_s14   ;;  %s570_s14 = sphi %s600_s14, %s21_s14   ;;  %s566_s13 = sphi %s598_s13, %s765_s13   ;;  %s562_s12 = sphi %s596_s12, %s764_s12   ;;  %s558_s11 = sphi %s594_s11, %s763_s11   ;;  %s554_s10 = sphi %s592_s10, %s762_s10   ;;  %s550_s9 = sphi %s590_s9, %s761_s9  }
   0x9   : > { %s33_s17 = sadd.s32 1, %s566_s13  ;;  %s42_s18 = sadd.s32 1, %s558_s11 }
   0xa   : > { %p35_p0 = scmp.ge.s32.totalorder %s33_s17, 2  ;;  %p49_p1 = scmp.ne.s32.totalorder %s558_s11, %s554_s10 }
   0xb   : > { %p50_p2 = scmp.eq.s32.totalorder %s570_s14, 0  ;;  %p55_p3 = scmp.ne.s32.totalorder %s554_s10, %s550_s9 }
   0xc   : > { %s767_s17 = smov (%p35_p0, %s33_s17), 0  ;;  %p56_p5 = scmp.eq.s32.totalorder %s346_s15, 0 }
   0xd   : > { %p631_p4 = por %p50_p2, %p49_p1  ;;  %s39_s20 = ssub.s32 %s566_s13, %s767_s17 }
   0xe   : > { %p107_p6 = scmp.eq.s32.totalorder %s346_s15, 1  ;;  %p40_p7 = scmp.eq.s32.totalorder %s39_s20, 0 }
   0xf   : > { %p637_p8 = por %p56_p5, %p55_p3  ;;  %p113_p10 = scmp.eq.s32.totalorder %s347_s16, 1 }
  0x10   : > { %p641_p9 = por %p107_p6, %p49_p1  ;;  %p379_p13 = scmp.lt.s32.totalorder %s570_s14, 2 }
  0x11   : > { %s646_s23 = scalar_select %p40_p7, %s558_s11, %s42_s18  }
  0x12   : > { %p648_p11 = por %p113_p10, %p55_p3  ;;  %s655_s25 = sand.u32 1, %s558_s11  }
  0x13   : > { %s350_s26 = sshll.u32 %s655_s25, 3  ;;  %s351_s27 = sshll.u32 %s566_s13, 7 }
  0x14   : > { %s143_s30 = scalar_lea.hbm %s751_s0, %s351_s27  ;;  %s137_s3 = scalar_lea.vmem [#allocation2], %s350_s26 }
  0x15   : > { %s145_s4 = sshll.u32 %s137_s3, 4  ;;  %p664_p0 = pnand %p379_p13, %p631_p4  ;;  %s146_s4 = int_to_ptr.vmem [resolvable:$true] %s145_s4 }
  0x16   : > { %p354_p1 = scmp.ge.s32.totalorder %s570_s14, 1  ;;  %p169_p2 = scmp.lt.s32.totalorder %s570_s14, 3 }
  0x17   : > { %s134_s6 = scalar_lea.sflag [#allocation3], %s655_s25  ;;  %p432_p3 = pneg %p664_p0 }
  0x18   : > { %s443_s7 = scalar_lea.vmem %s146_s4, 128  ;;  %s572_s8 = smov [#allocation2]  }
  0x19   : > { %p444_p5 = scmp.ne.s32.totalorder %s146_s4, %s443_s7  ;;  %s448_s15 = sshll.u32 %s572_s8, 4  ;;  %s449_s15 = int_to_ptr.vmem [resolvable:$false] %s448_s15 }
  0x1a   : > { %s450_s16 = scalar_lea.vmem %s449_s15, 256  ;;  %p451_p4 = scmp.lt.s32.totalorder %s146_s4, %s449_s15 }
  0x1b   : > { %p446_p6 = pnand %p444_p5, %p432_p3  ;;  %p452_p10 = scmp.lt.s32.totalorder %s450_s16, %s443_s7 }
  0x1d   : > { %p447_p7 = pneg %p446_p6  ;;  %p453_p13 = por %p452_p10, %p451_p4 }
  0x1f   : > { %p454_p12 = pnand %p453_p13, %p447_p7 }
  0x21   : > { %457 = shalt.err (!%p454_p12)
}
  0x22   : > { %371 = dma.hbm_to_vmem [thread:$0]  (!%p664_p0), %s143_s30, 128, %s146_s4, %s134_s6  }
  0x23   : > { %p682_p5 = pnand %p354_p1, %p169_p2  ;;  %s162_s28 = scalar_lea.hbm %s752_s1, %s351_s27 }
  0x24   : > { %s156_s29 = scalar_lea.vmem [#allocation5], %s350_s26  ;;  %s153_s7 = scalar_lea.sflag [#allocation6], %s655_s25 }
  0x25   : > { %s164_s3 = sshll.u32 %s156_s29, 4  ;;  %s573_s30 = smov [#allocation5]   ;;  %s165_s3 = int_to_ptr.vmem [resolvable:$true] %s164_s3 }
  0x26   : > { %s471_s8 = scalar_lea.vmem %s165_s3, 128  ;;  %s476_s4 = sshll.u32 %s573_s30, 4  ;;  %s477_s4 = int_to_ptr.vmem [resolvable:$false] %s476_s4 }
  0x27   : > { %p472_p12 = scmp.ne.s32.totalorder %s165_s3, %s471_s8  ;;  %s478_s6 = scalar_lea.vmem %s477_s4, 256 }
  0x28   : > { %p479_p1 = scmp.lt.s32.totalorder %s165_s3, %s477_s4  ;;  %p480_p2 = scmp.lt.s32.totalorder %s478_s6, %s471_s8 }
  0x29   : > { %p474_p6 = pnand %p472_p12, %p432_p3 }
  0x2a   : > { %p481_p4 = por %p480_p2, %p479_p1 }
  0x2b   : > { %p475_p7 = pneg %p474_p6 }
  0x2d   : > { %p482_p10 = pnand %p481_p4, %p475_p7 }
  0x2f   : > { %485 = shalt.err (!%p482_p10)
}
  0x30   : > { %374 = dma.hbm_to_vmem [thread:$0]  (!%p664_p0), %s162_s28, 128, %s165_s3, %s153_s7  }
  0x31   : > { %173 = sbr.rel (%p682_p5) target bundleno = 81 (0x51), region = 28  ;;  %s698_s25 = sand.u32 (!%p682_p5), 1, %s554_s10  }
  0x32   : > { %s355_s26 = sshll.u32 (!%p682_p5), %s698_s25, 3  ;;  %s176_s27 = scalar_lea.sflag (!%p682_p5), [#allocation3], %s698_s25 }
  0x33   : > { %s179_s15 = scalar_lea.vmem (!%p682_p5), [#allocation2], %s355_s26 }
  0x36   : > { %537 = dma.done.wait (%p637_p8), %s176_s27, 128  }
  0x37   : > { %539 = vsyncadd (%p637_p8), %s176_s27, 4294967168  ;;  %s185_s5 = scalar_lea.sflag [#allocation6], %s698_s25  ;;  %s188_s16 = scalar_lea.vmem [#allocation5], %s355_s26 }
  0x38   : > { %541 = dma.done.wait (%p637_p8), %s185_s5, 128  }
  0x39   : > { %543 = vsyncadd (%p637_p8), %s185_s5, 4294967168  ;;  %v221_v0 = vld [vmem:[%s179_s15] sm:$0xff]  ;;  %v222_v1 = vld [vmem:[%s188_s16] sm:$0xff]  ;;  %s359_s18 = sshll.u32 %s562_s12, 7  ;;  %s213_s19 = scalar_lea.vmem [#allocation7], %s355_s26 }
  0x3a   : > { %v223_v2 = vsub.f32 %v221_v0, %v222_v1  ;;  %s243_s20 = sshll.u32 %s213_s19, 4  ;;  %s241_s3 = scalar_lea.hbm %s753_s2, %s359_s18  ;;  %s244_s20 = int_to_ptr.vmem [resolvable:$true] %s243_s20 }
  0x3b   : > { %s230_s7 = scalar_lea.sflag [#allocation4], %s698_s25  ;;  %s486_s8 = scalar_lea.vmem %s244_s20, 128 }
  0x3c   : > { %v224_v3 = vmul.f32 %v223_v2, %v223_v2  ;;  %p487_p0 = scmp.ne.s32.totalorder %s244_s20, %s486_s8  ;;  %s574_s21 = smov [#allocation7]  }
  0x3d   : > { %s490_s30 = sshll.u32 %s574_s21, 4  ;;  %s491_s30 = int_to_ptr.vmem [resolvable:$false] %s490_s30 }
  0x3e   : > { %228 = vst [vmem:[%s213_s19] sm:$0xff] %v224_v3  ;;  %p488_p8 = pnand %p487_p0, %p641_p9  ;;  %s492_s4 = scalar_lea.vmem %s491_s30, 256 }
  0x3f   : > { %p493_p13 = scmp.lt.s32.totalorder %s244_s20, %s491_s30  ;;  %p494_p5 = scmp.lt.s32.totalorder %s492_s4, %s486_s8 }
  0x40   : > { %p489_p3 = pneg %p488_p8 }
  0x41   : > { %p495_p12 = por %p494_p5, %p493_p13 }
  0x43   : > { %p496_p6 = pnand %p495_p12, %p489_p3 }
  0x45   : > { %499 = shalt.err (!%p496_p6)
}
  0x46   : > { %s500_s12 = scalar_lea.hbm %s241_s3, 128  ;;  %s504_s26 = scalar_lea.hbm %s753_s2, 256 }
  0x47   : > { %p501_p7 = scmp.ne.s32.totalorder %s241_s3, %s500_s12  ;;  %p505_p4 = scmp.lt.s32.totalorder %s241_s3, %s753_s2 }
  0x48   : > { %p506_p10 = scmp.lt.s32.totalorder %s504_s26, %s500_s12 }
  0x49   : > { %p502_p1 = pnand %p501_p7, %p641_p9 }
  0x4a   : > { %p507_p0 = por %p506_p10, %p505_p4 }
  0x4b   : > { %p503_p2 = pneg %p502_p1 }
  0x4d   : > { %p508_p8 = pnand %p507_p0, %p503_p2 }
  0x4f   : > { %511 = shalt.err (!%p508_p8)
}
  0x50   : > { %366 = dma.vmem_to_hbm [thread:$0]  (%p641_p9), %s244_s20, 128, %s241_s3, %s230_s7  }
  0x51 PF: > { %s255_s5 = sand.u32 1, %s550_s9   ;;  %p760_p3 = scmp.ge.s32.totalorder %s570_s14, 2 }
  0x52   : > { %s256_s16 = scalar_lea.sflag [#allocation4], %s255_s5 }
  0x53   : > { %p376_p13 = pnand %p760_p3, %p648_p11 }
  0x55   : > { %p377_p5 = pneg %p376_p13 }
  0x57   : > { %545 = dma.done.wait (%p377_p5), %s256_s16, 128  }
  0x58   : > { %547 = vsyncadd (%p377_p5), %s256_s16, 4294967168  ;;  %s21_s14 = sadd.s32 1, %s570_s14   ;;  %s761_s9 = smov %s554_s10 }
  0x59   : > { %p18_p12 = scmp.ge.s32.totalorder %s21_s14, 4   ;;  %s762_s10 = smov %s558_s11 }
  0x5a   : > { %s763_s11 = smov %s646_s23  ;;  %s764_s12 = smov %s566_s13 }
  0x5b   : > { %s765_s13 = smov %s767_s17  ;;  %20 = sbr.rel (!%p18_p12) target bundleno = 8 (0x8), region = 90 }
  0x60   :  { %261 = vsyncpa [#allocation3], 1 }
  0x61   :  { %263 = vsyncpa [#allocation3 + $0x1], 1 }
  0x62   :  { %264 = vsyncpa [#allocation6], 1 }
  0x63   :  { %266 = vsyncpa [#allocation6 + $0x1], 1 }
  0x64   :  { %267 = vsyncpa [#allocation4], 1 }
  0x65   :  { %269 = vsyncpa [#allocation4 + $0x1], 1 }

</bundles_post_ra>
